<compile_context>
chip_gen: v7x
topology: tpu7x:2x2x1
jax: 0.10.0
libtpu: 0.0.40
codegen_flags: <defaults>
</compile_context>

<pallas_src>
import functools

import jax
import jax.numpy as jnp
from jax.experimental import pallas as pl
from jax.experimental.pallas import tpu as pltpu


def _round_up(n, m):
    return (n + m - 1) // m * m


# ---------------------------------------------------------------------------
# Kernels
# ---------------------------------------------------------------------------
def _ae_decode_kernel(x_ref, we_ref, be_ref, wd_ref, bd_ref, wy_ref, by_ref,
                      xrec_ref, y_ref):
    """Per batch tile: encoder -> sigmoid -> decoder + VPU y-head."""
    x = x_ref[...].astype(we_ref.dtype)                       # bf16 tile for MXU

    # Encoder: MXU bf16 matmul, f32 accumulate; bias + sigmoid in f32.
    h = jax.nn.sigmoid(
        jnp.dot(x, we_ref[...], preferred_element_type=jnp.float32)
        + be_ref[...])                                          # (TB, D_lat) f32

    # Decoder: MXU bf16 matmul, f32 accumulate.
    xrec_ref[...] = jax.nn.sigmoid(
        jnp.dot(h.astype(wd_ref.dtype), wd_ref[...],
                preferred_element_type=jnp.float32)
        + bd_ref[...])                                          # (TB, D_in)

    # y head: (B,latent)x(latent,1) is a wasteful MXU shape -> VPU mul + lane reduce.
    y = jax.nn.sigmoid(
        jnp.sum(h * wy_ref[...], axis=-1, keepdims=True) + by_ref[...])  # (TB, 1)
    # Lane-dense store (unmasked vst); wrapper slices back to (B, 1).
    y_ref[...] = jnp.broadcast_to(y, y_ref.shape)


def _ae_encode_kernel(x_ref, we_ref, be_ref, wy_ref, by_ref, h_ref, y_ref):
    """decode=False variant: no decoder matmul, no X_rec writeback."""
    x = x_ref[...].astype(we_ref.dtype)
    h = jax.nn.sigmoid(
        jnp.dot(x, we_ref[...], preferred_element_type=jnp.float32)
        + be_ref[...])
    h_ref[...] = h
    y = jax.nn.sigmoid(
        jnp.sum(h * wy_ref[...], axis=-1, keepdims=True) + by_ref[...])
    y_ref[...] = jnp.broadcast_to(y, y_ref.shape)


# ---------------------------------------------------------------------------
# Wrapper
# ---------------------------------------------------------------------------
@functools.partial(jax.jit, static_argnames=("decode", "block_batch", "mxu_dtype"))
def ae_forward(x, params, decode=True, block_batch=256, mxu_dtype=jnp.bfloat16):
    """Pallas-backed forward of the AE module.

    x: (B, input_dim) float32
    params: dict of PyTorch-convention weights/biases (W[out, in], b[1, out]).
    Returns (X_rec, y) if decode else (H, y).
    """
    B, input_dim = x.shape
    latent_dim = params["we"].shape[0]

    # Pad feature dims to lane multiples once in the wrapper (128 lanes).
    d_in = _round_up(input_dim, 128)
    d_lat = _round_up(latent_dim, 128)

    # Batch tile: multiple of 8 (f32 sublane), capped by block_batch.
    tb = min(block_batch, _round_up(B, 8))
    b_pad = _round_up(B, tb)
    grid = (b_pad // tb,)

    # Pre-transpose + zero-pad weights (no .T in-kernel); bf16 MXU operands,
    # f32 biases. Zero-padded weight entries keep the math exact.
    we_t = jnp.zeros((d_in, d_lat), mxu_dtype).at[:input_dim, :latent_dim].set(
        params["we"].T.astype(mxu_dtype))
    be = jnp.zeros((1, d_lat), jnp.float32).at[:, :latent_dim].set(
        params["be"].reshape(1, latent_dim).astype(jnp.float32))
    wy = jnp.zeros((1, d_lat), jnp.float32).at[:, :latent_dim].set(
        params["wy"].reshape(1, latent_dim).astype(jnp.float32))
    by = params["by"].reshape(1, 1).astype(jnp.float32)

    x_p = jnp.zeros((b_pad, d_in), x.dtype).at[:B, :input_dim].set(x)

    # Weights/biases: full-array blocks with constant index_map -> DMA'd once
    # and VMEM-resident across all batch tiles.
    const = lambda i: (0, 0)
    x_spec = pl.BlockSpec((tb, d_in), lambda i: (i, 0))
    y_spec = pl.BlockSpec((tb, 128), lambda i: (i, 0))
    cparams = pltpu.CompilerParams(dimension_semantics=("parallel",))

    if decode:
        wd_t = jnp.zeros((d_lat, d_in), mxu_dtype).at[:latent_dim, :input_dim].set(
            params["wd"].T.astype(mxu_dtype))
        bd = jnp.zeros((1, d_in), jnp.float32).at[:, :input_dim].set(
            params["bd"].reshape(1, input_dim).astype(jnp.float32))

        x_rec, y = pl.pallas_call(
            _ae_decode_kernel,
            grid=grid,
            in_specs=[
                x_spec,
                pl.BlockSpec((d_in, d_lat), const),   # We.T (resident)
                pl.BlockSpec((1, d_lat), const),      # be
                pl.BlockSpec((d_lat, d_in), const),   # Wd.T (resident)
                pl.BlockSpec((1, d_in), const),       # bd
                pl.BlockSpec((1, d_lat), const),      # wy row (f32, VPU path)
                pl.BlockSpec((1, 1), const),          # by
            ],
            out_specs=(
                pl.BlockSpec((tb, d_in), lambda i: (i, 0)),
                y_spec,
            ),
            out_shape=(
                jax.ShapeDtypeStruct((b_pad, d_in), jnp.float32),
                jax.ShapeDtypeStruct((b_pad, 128), jnp.float32),
            ),
            compiler_params=cparams,
        )(x_p, we_t, be, wd_t, bd, wy, by)
        return x_rec[:B, :input_dim], y[:B, :1]

    h, y = pl.pallas_call(
        _ae_encode_kernel,
        grid=grid,
        in_specs=[
            x_spec,
            pl.BlockSpec((d_in, d_lat), const),
            pl.BlockSpec((1, d_lat), const),
            pl.BlockSpec((1, d_lat), const),
            pl.BlockSpec((1, 1), const),
        ],
        out_specs=(
            pl.BlockSpec((tb, d_lat), lambda i: (i, 0)),
            y_spec,
        ),
        out_shape=(
            jax.ShapeDtypeStruct((b_pad, d_lat), jnp.float32),
            jax.ShapeDtypeStruct((b_pad, 128), jnp.float32),
        ),
        compiler_params=cparams,
    )(x_p, we_t, be, wy, by)
    return h[:B, :latent_dim], y[:B, :1]


# ---------------------------------------------------------------------------
# Parameters & references
# ---------------------------------------------------------------------------
def init_params(key, input_dim, latent_dim):
    """Deterministic synthetic parameters matching nn.Linear shapes."""
    ks = jax.random.split(key, 6)

    def lin(kw, kb, fan_in, fan_out):
        bound = 1.0 / jnp.sqrt(fan_in)
        w = jax.random.uniform(kw, (fan_out, fan_in), jnp.float32, -bound, bound)
        b = jax.random.uniform(kb, (1, fan_out), jnp.float32, -bound, bound)
        return w, b

    we, be = lin(ks[0], ks[1], input_dim, latent_dim)   # encoder
    wd, bd = lin(ks[2], ks[3], latent_dim, input_dim)   # decoder
    wy, by = lin(ks[4], ks[5], latent_dim, 1)           # y_layer
    return dict(we=we, be=be, wd=wd, bd=bd, wy=wy, by=by)


def _reference_f32(x, p):
    """Pure-f32 PyTorch-equivalent reference."""
    h = jax.nn.sigmoid(x @ p["we"].T + p["be"].reshape(1, -1))
    x_rec = jax.nn.sigmoid(h @ p["wd"].T + p["bd"].reshape(1, -1))
    y = jax.nn.sigmoid(h @ p["wy"].T + p["by"].reshape(1, 1))
    return x_rec, y, h


def _reference_matched(x, p, mxu_dtype=jnp.bfloat16):
    """Reference with the same bf16 MXU operand casts the kernel uses."""
    dt = mxu_dtype
    h = jax.nn.sigmoid(
        jnp.dot(x.astype(dt), p["we"].T.astype(dt),
                preferred_element_type=jnp.float32) + p["be"].reshape(1, -1))
    x_rec = jax.nn.sigmoid(
        jnp.dot(h.astype(dt), p["wd"].T.astype(dt),
                preferred_element_type=jnp.float32) + p["bd"].reshape(1, -1))
    y = jax.nn.sigmoid(
        jnp.sum(h * p["wy"].reshape(1, -1), axis=-1, keepdims=True)
        + p["by"].reshape(1, 1))
    return x_rec, y, h


if __name__ == "__main__":
    key = jax.random.PRNGKey(0)
    k_x, k_p = jax.random.split(key)

    batch, input_dim, latent_dim = 8, 32, 16
    x = jax.random.normal(k_x, (batch, input_dim), jnp.float32)
    params = init_params(k_p, input_dim, latent_dim)

    # decode=True path
    x_rec, y = ae_forward(x, params, decode=True)
    jax.block_until_ready((x_rec, y))

    # decode=False path (specialized kernel, no decoder work)
    h, y2 = ae_forward(x, params, decode=False)
    jax.block_until_ready((h, y2))

    assert x_rec.shape == (batch, input_dim)
    assert y.shape == (batch, 1)
    assert h.shape == (batch, latent_dim)

    # Tight check vs a reference using identical bf16 MXU casts.
    ref_xrec, ref_y, ref_h = _reference_matched(x, params)
    assert jnp.allclose(x_rec, ref_xrec, atol=1e-3, rtol=1e-3)
    assert jnp.allclose(y, ref_y, atol=1e-3, rtol=1e-3)
    assert jnp.allclose(h, ref_h, atol=1e-3, rtol=1e-3)
    assert jnp.allclose(y, y2, atol=1e-6)

    # Loose sanity check vs the pure-f32 PyTorch-equivalent reference.
    f32_xrec, f32_y, f32_h = _reference_f32(x, params)
    assert jnp.allclose(x_rec, f32_xrec, atol=2e-2)
    assert jnp.allclose(y, f32_y, atol=2e-2)
    assert jnp.allclose(h, f32_h, atol=2e-2)

    print("KERNEL_OK")
</pallas_src>

<mosaic_0001>
module attributes {stable_mosaic.version = 11 : i64} {
  func.func @_ae_decode_kernel(%arg0: i32, %arg1: memref<8x128xf32, #tpu.memory_space<vmem>>, %arg2: memref<128x128xbf16, #tpu.memory_space<vmem>>, %arg3: memref<1x128xf32, #tpu.memory_space<vmem>>, %arg4: memref<128x128xbf16, #tpu.memory_space<vmem>>, %arg5: memref<1x128xf32, #tpu.memory_space<vmem>>, %arg6: memref<1x128xf32, #tpu.memory_space<vmem>>, %arg7: memref<1x1xf32, #tpu.memory_space<vmem>>, %arg8: memref<8x128xf32, #tpu.memory_space<vmem>>, %arg9: memref<8x128xf32, #tpu.memory_space<vmem>>) attributes {dimension_semantics = [#tpu.dimension_semantics<parallel>], iteration_bounds = array<i64: 1>, scalar_prefetch = 0 : i64, scratch_operands = 0 : i64, tpu.core_type = #tpu.core_type<tc>, window_params = [{transform_indices = @transform_0, window_bounds = array<i64: 8, 128>}, {pipeline_mode = #tpu.pipeline_mode<synchronous>, transform_indices = @transform_1, window_bounds = array<i64: 128, 128>}, {pipeline_mode = #tpu.pipeline_mode<synchronous>, transform_indices = @transform_2, window_bounds = array<i64: 1, 128>}, {pipeline_mode = #tpu.pipeline_mode<synchronous>, transform_indices = @transform_3, window_bounds = array<i64: 128, 128>}, {pipeline_mode = #tpu.pipeline_mode<synchronous>, transform_indices = @transform_4, window_bounds = array<i64: 1, 128>}, {pipeline_mode = #tpu.pipeline_mode<synchronous>, transform_indices = @transform_5, window_bounds = array<i64: 1, 128>}, {pipeline_mode = #tpu.pipeline_mode<synchronous>, transform_indices = @transform_6, window_bounds = array<i64: 1, 1>}, {transform_indices = @transform_7, window_bounds = array<i64: 8, 128>}, {transform_indices = @transform_8, window_bounds = array<i64: 8, 128>}]} {
    %c0 = arith.constant 0 : index
    %c0_0 = arith.constant 0 : index
    %0 = vector.load %arg1[%c0, %c0_0] : memref<8x128xf32, #tpu.memory_space<vmem>>, vector<8x128xf32>
    %1 = arith.truncf %0 : vector<8x128xf32> to vector<8x128xbf16>
    %c0_1 = arith.constant 0 : index
    %c0_2 = arith.constant 0 : index
    %2 = vector.load %arg2[%c0_1, %c0_2] : memref<128x128xbf16, #tpu.memory_space<vmem>>, vector<128x128xbf16>
    %cst = arith.constant dense<0.000000e+00> : vector<8x128xf32>
    %3 = tpu.matmul %1, %2, %cst {dimension_numbers = #tpu.dot_dimension_numbers<[1], [0], [0], [1], [0, 0, 1, 1], [], []>} : vector<8x128xbf16>, vector<128x128xbf16>, vector<8x128xf32> -> vector<8x128xf32>
    %c0_3 = arith.constant 0 : index
    %c0_4 = arith.constant 0 : index
    %4 = vector.load %arg3[%c0_3, %c0_4] : memref<1x128xf32, #tpu.memory_space<vmem>>, vector<1x128xf32>
    %5 = vector.broadcast %4 : vector<1x128xf32> to vector<8x128xf32>
    %6 = arith.addf %3, %5 : vector<8x128xf32>
    %7 = arith.negf %6 : vector<8x128xf32>
    %8 = math.exp %7 : vector<8x128xf32>
    %cst_5 = arith.constant 1.000000e+00 : f32
    %9 = vector.broadcast %cst_5 : f32 to vector<8x128xf32>
    %10 = arith.addf %9, %8 : vector<8x128xf32>
    %11 = arith.divf %9, %10 : vector<8x128xf32>
    %12 = arith.truncf %11 : vector<8x128xf32> to vector<8x128xbf16>
    %c0_6 = arith.constant 0 : index
    %c0_7 = arith.constant 0 : index
    %13 = vector.load %arg4[%c0_6, %c0_7] : memref<128x128xbf16, #tpu.memory_space<vmem>>, vector<128x128xbf16>
    %cst_8 = arith.constant dense<0.000000e+00> : vector<8x128xf32>
    %14 = tpu.matmul %12, %13, %cst_8 {dimension_numbers = #tpu.dot_dimension_numbers<[1], [0], [0], [1], [0, 0, 1, 1], [], []>} : vector<8x128xbf16>, vector<128x128xbf16>, vector<8x128xf32> -> vector<8x128xf32>
    %c0_9 = arith.constant 0 : index
    %c0_10 = arith.constant 0 : index
    %15 = vector.load %arg5[%c0_9, %c0_10] : memref<1x128xf32, #tpu.memory_space<vmem>>, vector<1x128xf32>
    %16 = vector.broadcast %15 : vector<1x128xf32> to vector<8x128xf32>
    %17 = arith.addf %14, %16 : vector<8x128xf32>
    %18 = arith.negf %17 : vector<8x128xf32>
    %19 = math.exp %18 : vector<8x128xf32>
    %cst_11 = arith.constant 1.000000e+00 : f32
    %20 = vector.broadcast %cst_11 : f32 to vector<8x128xf32>
    %21 = arith.addf %20, %19 : vector<8x128xf32>
    %22 = arith.divf %20, %21 : vector<8x128xf32>
    %c0_12 = arith.constant 0 : index
    %c0_13 = arith.constant 0 : index
    %23 = vector.load %arg8[%c0_12, %c0_13] : memref<8x128xf32, #tpu.memory_space<vmem>>, vector<8x128xf32>
    tpu.vector_store %arg8[%c0_12, %c0_13], %22 {strides = array<i32>} : memref<8x128xf32, #tpu.memory_space<vmem>>, vector<8x128xf32>,
    %c0_14 = arith.constant 0 : index
    %c0_15 = arith.constant 0 : index
    %24 = vector.load %arg6[%c0_14, %c0_15] : memref<1x128xf32, #tpu.memory_space<vmem>>, vector<1x128xf32>
    %25 = vector.broadcast %24 : vector<1x128xf32> to vector<8x128xf32>
    %26 = arith.mulf %11, %25 : vector<8x128xf32>
    %cst_16 = arith.constant dense<0.000000e+00> : vector<8xf32>
    %27 = vector.multi_reduction <add>, %26, %cst_16 [1] : vector<8x128xf32> to vector<8xf32>
    %28 = vector.shape_cast %27 : vector<8xf32> to vector<8x1xf32>
    %c0_17 = arith.constant 0 : index
    %c0_18 = arith.constant 0 : index
    %29 = vector.load %arg7[%c0_17, %c0_18] : memref<1x1xf32, #tpu.memory_space<vmem>>, vector<1x1xf32>
    %30 = vector.broadcast %29 : vector<1x1xf32> to vector<8x1xf32>
    %31 = arith.addf %28, %30 : vector<8x1xf32>
    %32 = arith.negf %31 : vector<8x1xf32>
    %33 = math.exp %32 : vector<8x1xf32>
    %cst_19 = arith.constant 1.000000e+00 : f32
    %34 = vector.broadcast %cst_19 : f32 to vector<8x1xf32>
    %35 = arith.addf %34, %33 : vector<8x1xf32>
    %36 = arith.divf %34, %35 : vector<8x1xf32>
    %37 = vector.shape_cast %36 : vector<8x1xf32> to vector<8x1xf32>
    %38 = vector.broadcast %37 : vector<8x1xf32> to vector<8x128xf32>
    %c0_20 = arith.constant 0 : index
    %c0_21 = arith.constant 0 : index
    %39 = vector.load %arg9[%c0_20, %c0_21] : memref<8x128xf32, #tpu.memory_space<vmem>>, vector<8x128xf32>
    tpu.vector_store %arg9[%c0_20, %c0_21], %38 {strides = array<i32>} : memref<8x128xf32, #tpu.memory_space<vmem>>, vector<8x128xf32>,
    return
  }
  func.func @transform_0(%arg0: i32) -> (i32, i32) {
    %c0_i32 = arith.constant 0 : i32
    %c0_i32_0 = arith.constant 0 : i32
    return %arg0, %c0_i32 : i32, i32
  }
  func.func @transform_1(%arg0: i32) -> (i32, i32) {
    %c0_i32 = arith.constant 0 : i32
    %c0_i32_0 = arith.constant 0 : i32
    %c0_i32_1 = arith.constant 0 : i32
    return %c0_i32, %c0_i32_0 : i32, i32
  }
  func.func @transform_2(%arg0: i32) -> (i32, i32) {
    %c0_i32 = arith.constant 0 : i32
    %c0_i32_0 = arith.constant 0 : i32
    %c0_i32_1 = arith.constant 0 : i32
    return %c0_i32, %c0_i32_0 : i32, i32
  }
  func.func @transform_3(%arg0: i32) -> (i32, i32) {
    %c0_i32 = arith.constant 0 : i32
    %c0_i32_0 = arith.constant 0 : i32
    %c0_i32_1 = arith.constant 0 : i32
    return %c0_i32, %c0_i32_0 : i32, i32
  }
  func.func @transform_4(%arg0: i32) -> (i32, i32) {
    %c0_i32 = arith.constant 0 : i32
    %c0_i32_0 = arith.constant 0 : i32
    %c0_i32_1 = arith.constant 0 : i32
    return %c0_i32, %c0_i32_0 : i32, i32
  }
  func.func @transform_5(%arg0: i32) -> (i32, i32) {
    %c0_i32 = arith.constant 0 : i32
    %c0_i32_0 = arith.constant 0 : i32
    %c0_i32_1 = arith.constant 0 : i32
    return %c0_i32, %c0_i32_0 : i32, i32
  }
  func.func @transform_6(%arg0: i32) -> (i32, i32) {
    %c0_i32 = arith.constant 0 : i32
    %c0_i32_0 = arith.constant 0 : i32
    %c0_i32_1 = arith.constant 0 : i32
    return %c0_i32, %c0_i32_0 : i32, i32
  }
  func.func @transform_7(%arg0: i32) -> (i32, i32) {
    %c0_i32 = arith.constant 0 : i32
    %c0_i32_0 = arith.constant 0 : i32
    return %arg0, %c0_i32 : i32, i32
  }
  func.func @transform_8(%arg0: i32) -> (i32, i32) {
    %c0_i32 = arith.constant 0 : i32
    %c0_i32_0 = arith.constant 0 : i32
    return %arg0, %c0_i32 : i32, i32
  }
}

</mosaic_0001>

<bundles_post_ra>
// kernel: ae_forward.1
= control target key start
LH: loop header
LB: loop body
LE: loop exit
PB: predicated region body
PF: predicated region fallthrough
CT: control target
= control target key end

     0   :  { %s583_s0 = inlined_call_operand.vmem [shape: f32[8,128], index: 0, kind: input, shape index: {}]   ;;  %s584_s1 = inlined_call_operand.vmem [shape: bf16[128,128], index: 1, kind: input, shape index: {}]   ;;  %s585_s2 = inlined_call_operand.vmem [shape: f32[1,128], index: 2, kind: input, shape index: {}]   ;;  %s586_s3 = inlined_call_operand.vmem [shape: bf16[128,128], index: 3, kind: input, shape index: {}]   ;;  %s587_s4 = inlined_call_operand.vmem [shape: f32[1,128], index: 4, kind: input, shape index: {}]   ;;  %s588_s5 = inlined_call_operand.vmem [shape: f32[1,128], index: 5, kind: input, shape index: {}]   ;;  %s589_s6 = inlined_call_operand.<no memory space> [shape: f32[1,1], index: 6, kind: input, shape index: {}]   ;;  %s590_s7 = inlined_call_operand.hbm [shape: f32[8,128], index: 7, kind: output, shape index: {0}]   ;;  %s591_s8 = inlined_call_operand.vmem [shape: f32[8,128], index: 8, kind: output, shape index: {1}]  }
   0x1   :  { %v14_v0 = vstv %s589_s6 }
   0x2   :  { %15 = vst [vmem:[#allocation2] sm:$0x1] %v14_v0 }
   0x3   :  { %v404_v1 = vld [vmem:[%s584_s1] sm:$0xff]   ;;  %v456_v2 = vmov 0.0   ;;  %v405_v3 = vld [vmem:[%s584_s1 + $0x8] sm:$0xff]   ;;  %vm457_vm0 = vmmov 0   ;;  %v406_v4 = vld [vmem:[%s584_s1 + $0x10] sm:$0xff]  }
   0x4   :  { %359 = vmatprep.subr.bf16.mxu0 %v456_v2  ;;  %379 = vmatprep.subr.bf16.mxu1 %v456_v2  ;;  %v407_v5 = vld [vmem:[%s584_s1 + $0x18] sm:$0xff]   ;;  %v408_v6 = vld [vmem:[%s584_s1 + $0x20] sm:$0xff]  }
   0x5   :  { %360 = vmatpush3.bf16.msra.mxu0 %v404_v1  ;;  %375 = vmatprep.mubr.msk.bf16.mxu0 %vm457_vm0, %v456_v2 }
   0x6   :  { %361 = vmatprep.subr.bf16.mxu0 %v456_v2  ;;  %395 = vmatprep.mubr.msk.bf16.mxu1 %vm457_vm0, %v456_v2 }
   0x9   :  { %362 = vmatpush3.bf16.msra.mxu0 %v405_v3 }
   0xa   :  { %363 = vmatprep.subr.bf16.mxu0 %v456_v2 }
   0xd   :  { %364 = vmatpush3.bf16.msra.mxu0 %v406_v4 }
   0xe   :  { %365 = vmatprep.subr.bf16.mxu0 %v456_v2 }
  0x11   :  { %366 = vmatpush3.bf16.msra.mxu0 %v407_v5 }
  0x12   :  { %16 = vsyncpa [#allocation4], 0  ;;  %367 = vmatprep.subr.bf16.mxu0 %v456_v2  ;;  %v409_v7 = vld [vmem:[%s584_s1 + $0x28] sm:$0xff]   ;;  %v410_v8 = vld [vmem:[%s584_s1 + $0x30] sm:$0xff]   ;;  %v458_v33 = vmov 0  }
  0x13   :  { %v411_v9 = vld [vmem:[%s584_s1 + $0x38] sm:$0xff]   ;;  %v32_v10 = vld [vmem:[%s583_s0] sm:$0xff]  ;;  %v413_v13 = vld [vmem:[%s586_s3 + $0x8] sm:$0xff]   ;;  %403 = vset.pattern.permute.xlu0 %v458_v33 }
  0x14   :  { %v33_v11 = vpack.c.bf16 %v32_v10, %v32_v10  ;;  %v412_v12 = vld [vmem:[%s586_s3] sm:$0xff]   ;;  %v414_v14 = vld [vmem:[%s586_s3 + $0x10] sm:$0xff]   ;;  %v415_v15 = vld [vmem:[%s586_s3 + $0x18] sm:$0xff]  }
  0x15   :  { %368 = vmatpush3.bf16.msra.mxu0 %v408_v6  ;;  %380 = vmatpush3.bf16.msra.mxu1 %v412_v12  ;;  %v416_v16 = vld [vmem:[%s586_s3 + $0x20] sm:$0xff]   ;;  %v417_v17 = vld [vmem:[%s586_s3 + $0x28] sm:$0xff]   ;;  %v418_v18 = vld [vmem:[%s586_s3 + $0x30] sm:$0xff]  }
  0x16   :  { %369 = vmatprep.subr.bf16.mxu0 %v456_v2  ;;  %381 = vmatprep.subr.bf16.mxu1 %v456_v2  ;;  %v419_v19 = vld [vmem:[%s586_s3 + $0x38] sm:$0xff]   ;;  %v318_v20 = vld [vmem:[%s585_s2] ss:$0 sm:$0xff] }
  0x17   :  { %v338_v29 = vld [vmem:[%s588_s5] ss:$0 sm:$0xff]  ;;  %s459_s5 = smov [#allocation3]  }
  0x18   :  { %v339_v34 = vld [vmem:[#allocation2] ss:$0 sm:$0xff]  ;;  %s306_s19 = sshll.u32 %s459_s5, 4  ;;  %s307_s19 = int_to_ptr.vmem [resolvable:$true] %s306_s19 }
  0x19   :  { %370 = vmatpush3.bf16.msra.mxu0 %v409_v7  ;;  %382 = vmatpush3.bf16.msra.mxu1 %v413_v13  ;;  %v328_v41 = vld [vmem:[%s587_s4] ss:$0 sm:$0xff]  ;;  %s432_s20 = scalar_lea.vmem %s307_s19, 128  ;;  %p437_p1 = scmp.lt.s32.totalorder %s307_s19, %s307_s19 }
  0x1a   :  { %371 = vmatprep.subr.bf16.mxu0 %v456_v2  ;;  %383 = vmatprep.subr.bf16.mxu1 %v456_v2  ;;  %p433_p0 = scmp.ne.s32.totalorder %s307_s19, %s432_s20  ;;  %p438_p2 = scmp.lt.s32.totalorder %s432_s20, %s432_s20 }
  0x1c   :  { %p439_p3 = por %p438_p2, %p437_p1 }
  0x1d   :  { %372 = vmatpush3.bf16.msra.mxu0 %v410_v8  ;;  %384 = vmatpush3.bf16.msra.mxu1 %v414_v14 }
  0x1e   :  { %373 = vmatprep.subr.bf16.mxu0 %v456_v2  ;;  %385 = vmatprep.subr.bf16.mxu1 %v456_v2  ;;  %p440_p4 = pnand %p439_p3, %p433_p0 }
  0x21   :  { %374 = vmatpush3.bf16.msra.mxu0 %v411_v9  ;;  %386 = vmatpush3.bf16.msra.mxu1 %v415_v15 }
  0x22   :  { %387 = vmatprep.subr.bf16.mxu1 %v456_v2 }
  0x24   :  { %376 = vmatmul.mubr.bf16.vlgmr.msra.gmra.mrb[0].mxu0 %v33_v11 }
  0x25   :  { %388 = vmatpush3.bf16.msra.mxu1 %v416_v16 }
  0x26   :  { %389 = vmatprep.subr.bf16.mxu1 %v456_v2 }
  0x29   :  { %390 = vmatpush3.bf16.msra.mxu1 %v417_v17 }
  0x2a   :  { %391 = vmatprep.subr.bf16.mxu1 %v456_v2 }
  0x2d   :  { %392 = vmatpush3.bf16.msra.mxu1 %v418_v18 }
  0x2e   :  { %393 = vmatprep.subr.bf16.mxu1 %v456_v2 }
  0x31   :  { %394 = vmatpush3.bf16.msra.mxu1 %v419_v19 }
  0xf7   :  { %v139_v21 = vpop.f32.mrb[0].mxu0 }
  0xf8   :  { %v140_v22 = vadd.f32 %v318_v20, %v139_v21  ;;  %v377_v23 = vpop.f32.mrb[1].mxu0 }
  0xf9   :  { %v142_v24 = vpop.f32.mrb[2].mxu0 }
  0xfa   :  { %v327_v25 = vmul.f32 -1.442695, %v140_v22  ;;  %v378_v26 = vpop.f32.mrb[3].mxu0 }
  0xfc   :  { %420 = vpow2.f32 %v327_v25 }
 0x106   :  { %v421_v27 = vpop.eup %420 }
 0x107   :  { %v148_v28 = vadd.f32 1.0, %v421_v27 }
 0x109   :  { %422 = vrcp.f32 %v148_v28 }
 0x113   :  { %v423_v30 = vpop.eup %422 }
 0x114   :  { %v277_v31 = vmul.f32 %v423_v30, %v338_v29  ;;  %v151_v32 = vpack.c.bf16 %v423_v30, %v423_v30 }
 0x116   :  { %278 = vadd.xlane.f32.xlu0 %v277_v31  ;;  %396 = vmatmul.mubr.bf16.vlgmr.msra.gmra.mrb[0].mxu1 %v151_v32 }
 0x1a3   :  { %v279_v35 = vpop.xlane.xlu0 %278 }
 0x1a4   :  { %v287_v36 = vadd.f32 %v339_v34, %v279_v35 }
 0x1a6   :  { %v340_v37 = vmul.f32 -1.442695, %v287_v36 }
 0x1a8   :  { %424 = vpow2.f32 %v340_v37 }
 0x1b2   :  { %v425_v38 = vpop.eup %424 }
 0x1b3   :  { %v291_v39 = vadd.f32 1.0, %v425_v38 }
 0x1b5   :  { %426 = vrcp.f32 %v291_v39 }
 0x1bf   :  { %v427_v40 = vpop.eup %426 }
 0x1c0   :  { %296 = vperm.xlu0 %403, %v427_v40  }
 0x1e9   :  { %v257_v42 = vpop.f32.mrb[0].mxu1 }
 0x1ea   :  { %v258_v43 = vadd.f32 %v328_v41, %v257_v42  ;;  %v397_v44 = vpop.f32.mrb[1].mxu1 }
 0x1eb   :  { %v260_v45 = vpop.f32.mrb[2].mxu1 }
 0x1ec   :  { %v337_v46 = vmul.f32 -1.442695, %v258_v43  ;;  %v398_v47 = vpop.f32.mrb[3].mxu1 }
 0x1ee   :  { %428 = vpow2.f32 %v337_v46 }
 0x1f8   :  { %v429_v48 = vpop.eup %428 }
 0x1f9   :  { %v266_v49 = vadd.f32 1.0, %v429_v48 }
 0x1fb   :  { %430 = vrcp.f32 %v266_v49 }
 0x205   :  { %v431_v50 = vpop.eup %430 }
 0x206   :  { %269 = vst [vmem:[#allocation3] sm:$0xff] %v431_v50 }
 0x207   :  { %443 = shalt.err (!%p440_p4)
}
 0x208   :  { %s444_s22 = scalar_lea.hbm %s590_s7, 128 }
 0x209   :  { %p445_p5 = scmp.ne.s32.totalorder %s590_s7, %s444_s22  ;;  %p448_p6 = scmp.lt.u32.totalorder %s444_s22, %s590_s7 }
 0x20b   :  { %p450_p7 = pnand %p448_p6, %p445_p5 }
 0x20d   :  { %453 = shalt.err (!%p450_p7)
}
 0x20e   :  { %309 = dma.vmem_to_hbm [thread:$0]  %s307_s19, 128, %s590_s7, [#allocation4]  }
 0x23f   :  { %v297_v51 = vpop.permute.xlu0 %296 }
 0x240   :  { %299 = vst [vmem:[%s591_s8] sm:$0xff] %v297_v51 }
 0x241   :  { %454 = dma.done.wait [#allocation4], 128  }
 0x242   :  { %455 = vsyncadd [#allocation4], 4294967168 }
 0x243   :  { %317 = vsyncpa [#allocation4], 1 }

</bundles_post_ra>
